<compile_context>
chip_gen: v7x
topology: tpu7x:2x2x1
jax: 0.10.0
libtpu: 0.0.40
codegen_flags: <defaults>
</compile_context>

<pallas_src>
import functools

import jax
import jax.numpy as jnp
from jax.experimental import pallas as pl
from jax.experimental.pallas import tpu as pltpu

_VMEM_LIMIT = 32 * 1024 * 1024
VMEM_SPEC = pl.BlockSpec(memory_space=pltpu.MemorySpace.VMEM)


def _mosaic(*sem):
    return pltpu.CompilerParams(dimension_semantics=sem, vmem_limit_bytes=_VMEM_LIMIT)


def _row_tile(rows, max_tile=512):
    """Pick a row-block size that divides `rows` (full array if it already fits)."""
    if rows <= max_tile:
        return rows
    t = max_tile
    while t >= 8:
        if rows % t == 0:
            return t
        t -= 8
    return rows


# --------------------------------------------------------------------------------------
# Kernel 1: LayerNorm1 (current-segment rows only) + QKV projection, row-tiled.
# --------------------------------------------------------------------------------------
def _ln_qkv_kernel(mlen, klen, tm, cat_ref, g_ref, b_ref, qkvw_ref, wh_ref):
    i = pl.program_id(0)
    cat = cat_ref[...].astype(jnp.float32)                        # (tm, d_model)
    mu = jnp.mean(cat, axis=-1, keepdims=True)
    var = jnp.mean(jnp.square(cat - mu), axis=-1, keepdims=True)
    ln = (cat - mu) * jax.lax.rsqrt(var + 1e-5) * g_ref[...] + b_ref[...]
    # LN1 applies only to dec_inp rows (row-in-segment >= mlen); memory rows stay raw.
    row = (jax.lax.broadcasted_iota(jnp.int32, (tm, 1), 0) + i * tm) % klen
    x_in = jnp.where(row >= mlen, ln, cat).astype(jnp.bfloat16)
    wh_ref[...] = jax.lax.dot_general(
        x_in, qkvw_ref[...], (((1,), (0,)), ((), ())),
        preferred_element_type=jnp.float32).astype(jnp.bfloat16)


def fused_ln_qkv(params, cat_flat, mlen, klen):
    rows, d_model = cat_flat.shape
    three_hd = params["qkv_w"].shape[1]
    tm = _row_tile(rows)
    kern = functools.partial(_ln_qkv_kernel, mlen, klen, tm)
    row_spec = pl.BlockSpec((tm, d_model), lambda i: (i, 0))
    return pl.pallas_call(
        kern,
        grid=(rows // tm,),
        out_shape=jax.ShapeDtypeStruct((rows, three_hd), jnp.bfloat16),
        in_specs=[row_spec,
                  pl.BlockSpec((1, d_model), lambda i: (0, 0)),
                  pl.BlockSpec((1, d_model), lambda i: (0, 0)),
                  pl.BlockSpec((d_model, three_hd), lambda i: (0, 0))],
        out_specs=pl.BlockSpec((tm, three_hd), lambda i: (i, 0)),
        compiler_params=_mosaic("parallel"),
    )(cat_flat, params["ln1_g"], params["ln1_b"], params["qkv_w"])


# --------------------------------------------------------------------------------------
# Kernel 2: tiny R projection (klen, d_model) @ (d_model, hd) — grid-less, fully VMEM.
# --------------------------------------------------------------------------------------
def _r_proj_kernel(r_ref, rw_ref, rk_ref):
    rk_ref[...] = jax.lax.dot_general(
        r_ref[...].astype(jnp.bfloat16), rw_ref[...],
        (((1,), (0,)), ((), ())), preferred_element_type=jnp.float32).astype(jnp.bfloat16)


def r_projection(params, r2):
    klen = r2.shape[0]
    hd = params["r_w"].shape[1]
    return pl.pallas_call(
        _r_proj_kernel,
        out_shape=jax.ShapeDtypeStruct((klen, hd), jnp.bfloat16),
        in_specs=[VMEM_SPEC, VMEM_SPEC],
        out_specs=VMEM_SPEC,
        compiler_params=pltpu.CompilerParams(vmem_limit_bytes=_VMEM_LIMIT),
    )(r2, params["r_w"])


# --------------------------------------------------------------------------------------
# Kernel 3: fused relative multi-head attention
#           (scores + barrel-shift rel_shift + mask + softmax + P@V + single o_w matmul).
#           Grid: (bsz, qlen_tiles), both "parallel".
# --------------------------------------------------------------------------------------
def _rel_attn_kernel(n_head, d_head, mlen, qlen, tq, scale, with_probs,
                     wh_ref, rk_ref, rwb_ref, rrb_ref, mask_ref, ow_ref,
                     out_ref, *prob_refs):
    prob_ref = prob_refs[0] if with_probs else None
    hd = n_head * d_head
    qt = pl.program_id(1)

    wh_kv = wh_ref[0]                                      # (klen, 3*hd) bf16 (no f32 upcast)
    if tq == qlen:                                         # single q tile: static slice
        wh_q = wh_kv[mlen:mlen + tq, :]
    else:
        q_start = mlen + qt * tq
        if mlen % 8 == 0 and tq % 8 == 0:
            q_start = pl.multiple_of(q_start, 8)
        wh_q = wh_ref[0, pl.ds(q_start, tq), :]            # (tq, 3*hd) bf16
    rk = rk_ref[...]                                       # (klen, hd) bf16
    rwb = rwb_ref[...]                                     # (n_head, d_head) f32
    rrb = rrb_ref[...]
    masked = mask_ref[...] > 0.0                           # (tq, klen), True = masked
    ow = ow_ref[...]                                       # (hd, d_model) bf16

    # Transformer-XL rel_shift: shifted[i, j] = raw[i, j + (qlen-1) - i_global]; out-of-range
    # positions are zero-filled — they coincide exactly with the causal+memory mask.
    row = jax.lax.broadcasted_iota(jnp.int32, (tq, 1), 0) + qt * tq
    shift = (qlen - 1) - row                               # (tq, 1), per-row left shift

    dn_t = (((1,), (1,)), ((), ()))    # x @ y.T
    dn_m = (((1,), (0,)), ((), ()))    # x @ y

    pv_parts = []
    for h in range(n_head):            # static loop; scores stay in VMEM/vregs
        hs = slice(h * d_head, (h + 1) * d_head)
        qh = wh_q[:, hs].astype(jnp.float32)                                   # (tq, dh)
        kh = wh_kv[:, hd + h * d_head:hd + (h + 1) * d_head]                   # (klen, dh) bf16
        vh = wh_kv[:, 2 * hd + h * d_head:2 * hd + (h + 1) * d_head]           # (klen, dh) bf16
        rkh = rk[:, hs]                                                        # (klen, dh) bf16

        rw_q = (qh + rwb[h:h + 1, :]).astype(jnp.bfloat16)
        rr_q = (qh + rrb[h:h + 1, :]).astype(jnp.bfloat16)
        ac = jax.lax.dot_general(rw_q, kh, dn_t, preferred_element_type=jnp.float32)
        bd = jax.lax.dot_general(rr_q, rkh, dn_t, preferred_element_type=jnp.float32)

        # O(q*k*log q) barrel-shift rel_shift (no (q,k,k) temporary).
        s = 1
        while s < qlen:
            rolled = jnp.concatenate([bd[:, s:], jnp.zeros((tq, s), bd.dtype)], axis=1)
            bd = jnp.where((shift & s) != 0, rolled, bd)
            s *= 2

        score = (ac + bd) * scale
        score = jnp.where(masked, -1e30, score)
        m = jnp.max(score, axis=-1, keepdims=True)
        e = jnp.exp(score - m)
        p = e * pl.reciprocal(jnp.sum(e, axis=-1, keepdims=True), approx=True)
        if with_probs:
            prob_ref[0, h] = p.astype(prob_ref.dtype)
        pv_parts.append(
            jax.lax.dot_general(p.astype(jnp.bfloat16), vh, dn_m,
                                preferred_element_type=jnp.float32).astype(jnp.bfloat16))

    # Single full-contraction-depth output projection (o_w hoisted out of the head loop).
    pv_all = pv_parts[0] if n_head == 1 else jnp.concatenate(pv_parts, axis=1)
    out = jax.lax.dot_general(pv_all, ow, dn_m, preferred_element_type=jnp.float32)
    out_ref[0] = out.astype(out_ref.dtype)


def fused_rel_attention(w_heads, r_head_k, r_w_bias, r_r_bias, attn_mask, o_w, *,
                        n_head, d_head, mlen, need_probs=False):
    bsz, klen, three_hd = w_heads.shape
    qlen = klen - mlen
    hd = n_head * d_head
    d_model = o_w.shape[1]
    scale = 1.0 / (d_head ** 0.5)
    tq = _row_tile(qlen, max_tile=256)
    n_qt = qlen // tq

    kern = functools.partial(_rel_attn_kernel, n_head, d_head, mlen, qlen, tq, scale, need_probs)
    out_shapes = [jax.ShapeDtypeStruct((bsz, qlen, d_model), jnp.bfloat16)]
    out_specs = [pl.BlockSpec((1, tq, d_model), lambda b, q: (b, q, 0))]
    if need_probs:
        out_shapes.append(jax.ShapeDtypeStruct((bsz, n_head, qlen, klen), jnp.bfloat16))
        out_specs.append(pl.BlockSpec((1, n_head, tq, klen), lambda b, q: (b, 0, q, 0)))

    res = pl.pallas_call(
        kern,
        grid=(bsz, n_qt),
        in_specs=[
            pl.BlockSpec((1, klen, three_hd), lambda b, q: (b, 0, 0)),   # resident across q tiles
            pl.BlockSpec((klen, hd), lambda b, q: (0, 0)),
            pl.BlockSpec((n_head, d_head), lambda b, q: (0, 0)),
            pl.BlockSpec((n_head, d_head), lambda b, q: (0, 0)),
            pl.BlockSpec((tq, klen), lambda b, q: (q, 0)),
            pl.BlockSpec((hd, d_model), lambda b, q: (0, 0)),
        ],
        out_specs=tuple(out_specs),
        out_shape=tuple(out_shapes),
        compiler_params=_mosaic("parallel", "parallel"),
    )(w_heads, r_head_k, r_w_bias, r_r_bias, attn_mask, o_w)

    if need_probs:
        attn_out, attn_prob = res
    else:
        (attn_out,) = res
        attn_prob = None
    return attn_out, attn_prob


# --------------------------------------------------------------------------------------
# Kernel 4: GRU gating unit (F.relu of the branch fused in), row-tiled, merged weights.
# --------------------------------------------------------------------------------------
def _gru_kernel(x_ref, y_ref, wyg_ref, uxz_ref, ug_ref, bg_ref, o_ref):
    x = x_ref[...].astype(jnp.float32)
    y = jnp.maximum(y_ref[...].astype(jnp.float32), 0.0)   # F.relu applied to the branch
    xb = x.astype(jnp.bfloat16)
    yb = y.astype(jnp.bfloat16)
    d = x.shape[1]
    dn = (((1,), (0,)), ((), ()))

    wy = jax.lax.dot_general(yb, wyg_ref[...], dn, preferred_element_type=jnp.float32)  # (tm,3d)
    ux = jax.lax.dot_general(xb, uxz_ref[...], dn, preferred_element_type=jnp.float32)  # (tm,2d)
    r = jax.nn.sigmoid(wy[:, 0:d] + ux[:, 0:d])
    z = jax.nn.sigmoid(wy[:, d:2 * d] + ux[:, d:2 * d] - bg_ref[...])
    hg = jnp.tanh(wy[:, 2 * d:3 * d] +
                  jax.lax.dot_general((r * x).astype(jnp.bfloat16), ug_ref[...], dn,
                                      preferred_element_type=jnp.float32))
    o_ref[...] = ((1.0 - z) * x + z * hg).astype(o_ref.dtype)


def gru_gate(gp, x, y, out_dtype=jnp.bfloat16):
    rows, d_model = x.shape
    tm = _row_tile(rows)
    row_spec = pl.BlockSpec((tm, d_model), lambda i: (i, 0))
    return pl.pallas_call(
        _gru_kernel,
        grid=(rows // tm,),
        out_shape=jax.ShapeDtypeStruct((rows, d_model), out_dtype),
        in_specs=[row_spec, row_spec,
                  pl.BlockSpec((d_model, 3 * d_model), lambda i: (0, 0)),
                  pl.BlockSpec((d_model, 2 * d_model), lambda i: (0, 0)),
                  pl.BlockSpec((d_model, d_model), lambda i: (0, 0)),
                  pl.BlockSpec((1, d_model), lambda i: (0, 0))],
        out_specs=row_spec,
        compiler_params=_mosaic("parallel"),
    )(x, y, gp["wyg"], gp["uxz"], gp["ug"], gp["bg"])


# --------------------------------------------------------------------------------------
# Kernel 5: LayerNorm2 + PositionwiseFF (Linear -> ReLU -> Linear), row-tiled.
# --------------------------------------------------------------------------------------
def _ln_ffn_kernel(x_ref, g_ref, b_ref, w1_ref, b1_ref, w2_ref, b2_ref, o_ref):
    x = x_ref[...].astype(jnp.float32)
    mu = jnp.mean(x, axis=-1, keepdims=True)
    var = jnp.mean(jnp.square(x - mu), axis=-1, keepdims=True)
    ln = (x - mu) * jax.lax.rsqrt(var + 1e-5) * g_ref[...] + b_ref[...]
    dn = (((1,), (0,)), ((), ()))
    h = jax.lax.dot_general(ln.astype(jnp.bfloat16), w1_ref[...], dn,
                            preferred_element_type=jnp.float32) + b1_ref[...]
    h = jnp.maximum(h, 0.0)
    o_ref[...] = (jax.lax.dot_general(h.astype(jnp.bfloat16), w2_ref[...], dn,
                                      preferred_element_type=jnp.float32)
                  + b2_ref[...]).astype(o_ref.dtype)


def ln_ffn(params, x, out_dtype=jnp.bfloat16):
    rows, d_model = x.shape
    d_inner = params["ff_w1"].shape[1]
    tm = _row_tile(rows)
    row_spec = pl.BlockSpec((tm, d_model), lambda i: (i, 0))
    return pl.pallas_call(
        _ln_ffn_kernel,
        grid=(rows // tm,),
        out_shape=jax.ShapeDtypeStruct((rows, d_model), out_dtype),
        in_specs=[row_spec,
                  pl.BlockSpec((1, d_model), lambda i: (0, 0)),
                  pl.BlockSpec((1, d_model), lambda i: (0, 0)),
                  pl.BlockSpec((d_model, d_inner), lambda i: (0, 0)),
                  pl.BlockSpec((1, d_inner), lambda i: (0, 0)),
                  pl.BlockSpec((d_inner, d_model), lambda i: (0, 0)),
                  pl.BlockSpec((1, d_model), lambda i: (0, 0))],
        out_specs=row_spec,
        compiler_params=_mosaic("parallel"),
    )(x, params["ln2_g"], params["ln2_b"], params["ff_w1"], params["ff_b1"],
      params["ff_w2"], params["ff_b2"])


# --------------------------------------------------------------------------------------
# Decoder layer (forward_stable, use_gate=True)
# --------------------------------------------------------------------------------------
def decoder_layer_forward(params, dec_inp, r, r_w_bias, r_r_bias, dec_attn_mask, mems,
                          need_attn_probs=False):
    qlen, bsz, d_model = dec_inp.shape
    mlen = mems.shape[0]
    klen = qlen + mlen
    n_head, d_head = r_w_bias.shape

    # Batch-major layout internally: one transpose in, one transpose out.
    xb = jnp.transpose(dec_inp, (1, 0, 2))                      # (bsz, qlen, d_model)
    memsb = jnp.transpose(mems, (1, 0, 2))                      # (bsz, mlen, d_model)
    catb = jnp.concatenate([memsb, xb], axis=1)                 # (bsz, klen, d_model)
    cat_flat = catb.reshape(bsz * klen, d_model)
    r2 = r.reshape(klen, d_model)

    # LN1 + QKV projection (row-tiled), R projection (tiny, grid-less).
    wh_flat = fused_ln_qkv(params, cat_flat, mlen, klen)        # (bsz*klen, 3*hd) bf16
    w_heads = wh_flat.reshape(bsz, klen, 3 * n_head * d_head)
    r_head_k = r_projection(params, r2)                         # (klen, hd) bf16

    # Fused relative attention (scores + rel_shift + mask + softmax + PV + o_w).
    attn_out, attn_prob = fused_rel_attention(
        w_heads, r_head_k, r_w_bias, r_r_bias, dec_attn_mask, params["o_w"],
        n_head=n_head, d_head=d_head, mlen=mlen, need_probs=need_attn_probs)

    # dec_inp2 = gate_mha(dec_inp, relu(attn_out))
    x_flat = xb.reshape(bsz * qlen, d_model)
    a_flat = attn_out.reshape(bsz * qlen, d_model)
    gate1 = gru_gate(params["gate_mha"], x_flat, a_flat, out_dtype=jnp.bfloat16)

    # dec_inp3 = gate_mlp(dec_inp2, relu(pos_ff(layer_norm2(dec_inp2))))
    ff = ln_ffn(params, gate1, out_dtype=jnp.bfloat16)
    out_flat = gru_gate(params["gate_mlp"], gate1, ff, out_dtype=jnp.float32)

    out = out_flat.reshape(bsz, qlen, d_model).transpose(1, 0, 2)     # (qlen, bsz, d_model)
    if need_attn_probs:
        attn_prob = jnp.transpose(attn_prob, (2, 3, 0, 1))            # (qlen, klen, bsz, n_head)
    return out, attn_prob


# --------------------------------------------------------------------------------------
# Deterministic parameter construction (synthetic init; matmul weights stored in bf16).
# --------------------------------------------------------------------------------------
def init_params(key, n_head, d_model, d_head, d_inner, bg=2.0):
    keys = iter(jax.random.split(key, 24))

    def nrm(shape):
        return (jax.random.normal(next(keys), shape, jnp.float32) * 0.02).astype(jnp.bfloat16)

    def gate():
        return dict(
            wyg=nrm((d_model, 3 * d_model)),    # [Wr | Wz | Wg] merged (y side)
            uxz=nrm((d_model, 2 * d_model)),    # [Ur | Uz] merged (x side)
            ug=nrm((d_model, d_model)),         # Ug applied to (r * x)
            bg=jnp.full((1, d_model), bg, jnp.float32),
        )

    return dict(
        # linear weights stored pre-transposed as (in, out) so kernels do x @ W
        qkv_w=nrm((d_model, 3 * n_head * d_head)),
        r_w=nrm((d_model, n_head * d_head)),
        o_w=nrm((n_head * d_head, d_model)),
        ln1_g=jnp.ones((1, d_model), jnp.float32), ln1_b=jnp.zeros((1, d_model), jnp.float32),
        ln2_g=jnp.ones((1, d_model), jnp.float32), ln2_b=jnp.zeros((1, d_model), jnp.float32),
        ff_w1=nrm((d_model, d_inner)), ff_b1=jnp.zeros((1, d_inner), jnp.float32),
        ff_w2=nrm((d_inner, d_model)), ff_b2=jnp.zeros((1, d_model), jnp.float32),
        gate_mha=gate(), gate_mlp=gate(),
    )


if __name__ == "__main__":
    qlen, mlen, bsz = 8, 8, 2          # mlen kept 8-aligned -> sublane-aligned q slice
    n_head, d_model, d_head, d_inner = 2, 32, 16, 64
    klen = qlen + mlen

    key = jax.random.PRNGKey(0)
    ks = jax.random.split(key, 8)
    dec_inp = jax.random.normal(ks[0], (qlen, bsz, d_model), jnp.float32)
    r = jax.random.normal(ks[1], (klen, 1, d_model), jnp.float32)
    mems = jax.random.normal(ks[2], (mlen, bsz, d_model), jnp.float32)
    r_w_bias = jax.random.normal(ks[3], (n_head, d_head), jnp.float32) * 0.02
    r_r_bias = jax.random.normal(ks[4], (n_head, d_head), jnp.float32) * 0.02
    params = init_params(ks[5], n_head, d_model, d_head, d_inner)

    # standard Transformer-XL causal mask with memory: mask future positions j > i + mlen
    dec_attn_mask = jnp.triu(jnp.ones((qlen, klen), jnp.float32), k=1 + mlen)

    out, attn_weights = decoder_layer_forward(
        params, dec_inp, r, r_w_bias, r_r_bias, dec_attn_mask, mems, need_attn_probs=True
    )
    jax.block_until_ready((out, attn_weights))
    assert out.shape == (qlen, bsz, d_model)
    assert attn_weights.shape == (qlen, klen, bsz, n_head)
    assert bool(jnp.isfinite(out).all())
    print("KERNEL_OK")
</pallas_src>

<mosaic_0001>
module attributes {stable_mosaic.version = 11 : i64} {
  func.func @_ln_qkv_kernel(%arg0: i32, %arg1: memref<32x32xf32, #tpu.memory_space<vmem>>, %arg2: memref<1x32xf32, #tpu.memory_space<vmem>>, %arg3: memref<1x32xf32, #tpu.memory_space<vmem>>, %arg4: memref<32x96xbf16, #tpu.memory_space<vmem>>, %arg5: memref<32x96xbf16, #tpu.memory_space<vmem>>) attributes {dimension_semantics = [#tpu.dimension_semantics<parallel>], iteration_bounds = array<i64: 1>, scalar_prefetch = 0 : i64, scratch_operands = 0 : i64, tpu.core_type = #tpu.core_type<tc>, window_params = [{transform_indices = @transform_0, window_bounds = array<i64: 32, 32>}, {pipeline_mode = #tpu.pipeline_mode<synchronous>, transform_indices = @transform_1, window_bounds = array<i64: 1, 32>}, {pipeline_mode = #tpu.pipeline_mode<synchronous>, transform_indices = @transform_2, window_bounds = array<i64: 1, 32>}, {pipeline_mode = #tpu.pipeline_mode<synchronous>, transform_indices = @transform_3, window_bounds = array<i64: 32, 96>}, {transform_indices = @transform_4, window_bounds = array<i64: 32, 96>}]} {
    %c0 = arith.constant 0 : index
    %c0_0 = arith.constant 0 : index
    %0 = vector.load %arg1[%c0, %c0_0] : memref<32x32xf32, #tpu.memory_space<vmem>>, vector<32x32xf32>
    %cst = arith.constant dense<0.000000e+00> : vector<32xf32>
    %1 = vector.multi_reduction <add>, %0, %cst [1] : vector<32x32xf32> to vector<32xf32>
    %2 = vector.shape_cast %1 : vector<32xf32> to vector<32x1xf32>
    %cst_1 = arith.constant 3.200000e+01 : f32
    %3 = vector.broadcast %cst_1 : f32 to vector<32x1xf32>
    %4 = arith.divf %2, %3 : vector<32x1xf32>
    %5 = vector.broadcast %4 : vector<32x1xf32> to vector<32x32xf32>
    %6 = arith.subf %0, %5 : vector<32x32xf32>
    %7 = arith.mulf %6, %6 : vector<32x32xf32>
    %cst_2 = arith.constant dense<0.000000e+00> : vector<32xf32>
    %8 = vector.multi_reduction <add>, %7, %cst_2 [1] : vector<32x32xf32> to vector<32xf32>
    %9 = vector.shape_cast %8 : vector<32xf32> to vector<32x1xf32>
    %cst_3 = arith.constant 3.200000e+01 : f32
    %10 = vector.broadcast %cst_3 : f32 to vector<32x1xf32>
    %11 = arith.divf %9, %10 : vector<32x1xf32>
    %12 = vector.broadcast %4 : vector<32x1xf32> to vector<32x32xf32>
    %13 = arith.subf %0, %12 : vector<32x32xf32>
    %cst_4 = arith.constant 9.99999974E-6 : f32
    %14 = vector.broadcast %cst_4 : f32 to vector<32x1xf32>
    %15 = arith.addf %11, %14 : vector<32x1xf32>
    %16 = math.rsqrt %15 : vector<32x1xf32>
    %17 = vector.broadcast %16 : vector<32x1xf32> to vector<32x32xf32>
    %18 = arith.mulf %13, %17 : vector<32x32xf32>
    %c0_5 = arith.constant 0 : index
    %c0_6 = arith.constant 0 : index
    %19 = vector.load %arg2[%c0_5, %c0_6] : memref<1x32xf32, #tpu.memory_space<vmem>>, vector<1x32xf32>
    %20 = vector.broadcast %19 : vector<1x32xf32> to vector<32x32xf32>
    %21 = arith.mulf %18, %20 : vector<32x32xf32>
    %c0_7 = arith.constant 0 : index
    %c0_8 = arith.constant 0 : index
    %22 = vector.load %arg3[%c0_7, %c0_8] : memref<1x32xf32, #tpu.memory_space<vmem>>, vector<1x32xf32>
    %23 = vector.broadcast %22 : vector<1x32xf32> to vector<32x32xf32>
    %24 = arith.addf %21, %23 : vector<32x32xf32>
    %25 = tpu.iota {dimensions = array<i32: 0>} : vector<32x1xi32>
    %c32_i32 = arith.constant 32 : i32
    %26 = arith.muli %arg0, %c32_i32 : i32
    %27 = vector.broadcast %26 : i32 to vector<32x1xi32>
    %28 = arith.addi %25, %27 : vector<32x1xi32>
    %c16_i32 = arith.constant 16 : i32
    %c0_i32 = arith.constant 0 : i32
    %29 = arith.cmpi eq, %c16_i32, %c0_i32 : i32
    %c1_i32 = arith.constant 1 : i32
    %30 = arith.select %29, %c1_i32, %c16_i32 : i32
    %31 = vector.broadcast %30 : i32 to vector<32x1xi32>
    %32 = arith.remsi %28, %31 : vector<32x1xi32>
    %c0_i32_9 = arith.constant 0 : i32
    %33 = vector.broadcast %c0_i32_9 : i32 to vector<32x1xi32>
    %34 = arith.cmpi ne, %32, %33 : vector<32x1xi32>
    %c0_i32_10 = arith.constant 0 : i32
    %35 = vector.broadcast %c0_i32_10 : i32 to vector<32x1xi32>
    %36 = arith.cmpi slt, %32, %35 : vector<32x1xi32>
    %c0_i32_11 = arith.constant 0 : i32
    %37 = arith.cmpi slt, %30, %c0_i32_11 : i32
    %38 = vector.broadcast %37 : i1 to vector<32x1xi1>
    %39 = vector.broadcast %38 : vector<32x1xi1> to vector<32x1xi1>
    %40 = arith.xori %36, %39 : vector<32x1xi1>
    %41 = arith.andi %40, %34 : vector<32x1xi1>
    %42 = vector.broadcast %30 : i32 to vector<32x1xi32>
    %43 = arith.addi %32, %42 : vector<32x1xi32>
    %44 = arith.select %41, %43, %32 : vector<32x1xi1>, vector<32x1xi32>
    %c8_i32 = arith.constant 8 : i32
    %45 = vector.broadcast %c8_i32 : i32 to vector<32x1xi32>
    %46 = arith.cmpi sge, %44, %45 : vector<32x1xi32>
    %47 = vector.shape_cast %46 : vector<32x1xi1> to vector<32x1xi1>
    %48 = vector.broadcast %47 : vector<32x1xi1> to vector<32x32xi1>
    %49 = arith.select %48, %24, %0 : vector<32x32xi1>, vector<32x32xf32>
    %50 = arith.truncf %49 : vector<32x32xf32> to vector<32x32xbf16>
    %c0_12 = arith.constant 0 : index
    %c0_13 = arith.constant 0 : index
    %51 = vector.load %arg4[%c0_12, %c0_13] : memref<32x96xbf16, #tpu.memory_space<vmem>>, vector<32x96xbf16>
    %cst_14 = arith.constant dense<0.000000e+00> : vector<32x96xf32>
    %52 = tpu.matmul %50, %51, %cst_14 {dimension_numbers = #tpu.dot_dimension_numbers<[1], [0], [0], [1], [0, 0, 1, 1], [], []>} : vector<32x32xbf16>, vector<32x96xbf16>, vector<32x96xf32> -> vector<32x96xf32>
    %53 = arith.truncf %52 : vector<32x96xf32> to vector<32x96xbf16>
    %c0_15 = arith.constant 0 : index
    %c0_16 = arith.constant 0 : index
    %54 = vector.load %arg5[%c0_15, %c0_16] : memref<32x96xbf16, #tpu.memory_space<vmem>>, vector<32x96xbf16>
    tpu.vector_store %arg5[%c0_15, %c0_16], %53 {strides = array<i32>} : memref<32x96xbf16, #tpu.memory_space<vmem>>, vector<32x96xbf16>,
    return
  }
  func.func @transform_0(%arg0: i32) -> (i32, i32) {
    %c0_i32 = arith.constant 0 : i32
    %c0_i32_0 = arith.constant 0 : i32
    return %arg0, %c0_i32 : i32, i32
  }
  func.func @transform_1(%arg0: i32) -> (i32, i32) {
    %c0_i32 = arith.constant 0 : i32
    %c0_i32_0 = arith.constant 0 : i32
    %c0_i32_1 = arith.constant 0 : i32
    return %c0_i32, %c0_i32_0 : i32, i32
  }
  func.func @transform_2(%arg0: i32) -> (i32, i32) {
    %c0_i32 = arith.constant 0 : i32
    %c0_i32_0 = arith.constant 0 : i32
    %c0_i32_1 = arith.constant 0 : i32
    return %c0_i32, %c0_i32_0 : i32, i32
  }
  func.func @transform_3(%arg0: i32) -> (i32, i32) {
    %c0_i32 = arith.constant 0 : i32
    %c0_i32_0 = arith.constant 0 : i32
    %c0_i32_1 = arith.constant 0 : i32
    return %c0_i32, %c0_i32_0 : i32, i32
  }
  func.func @transform_4(%arg0: i32) -> (i32, i32) {
    %c0_i32 = arith.constant 0 : i32
    %c0_i32_0 = arith.constant 0 : i32
    return %arg0, %c0_i32 : i32, i32
  }
}

</mosaic_0001>

<bundles_post_ra>
// kernel: tpu_custom_call.1
= control target key start
LH: loop header
LB: loop body
LE: loop exit
PB: predicated region body
PF: predicated region fallthrough
CT: control target
= control target key end

     0   :  { %9 = vsyncpa [#allocation3], 0  ;;  %s511_s0 = inlined_call_operand.hbm [shape: f32[32,32], index: 0, kind: input, shape index: {}]   ;;  %s512_s1 = inlined_call_operand.vmem [shape: f32[1,32], index: 1, kind: input, shape index: {}]   ;;  %s513_s2 = inlined_call_operand.vmem [shape: f32[1,32], index: 2, kind: input, shape index: {}]   ;;  %s514_s3 = inlined_call_operand.hbm [shape: bf16[32,96], index: 3, kind: input, shape index: {}]   ;;  %s515_s4 = inlined_call_operand.hbm [shape: bf16[32,96], index: 4, kind: output, shape index: {}]  }
   0x1   :  { %10 = vsyncpa [#allocation6], 0 }
   0x2   :  { %11 = vsyncpa [#allocation4], 0  ;;  %s425_s15 = smov [#allocation2]   ;;  %s353_s19 = scalar_lea.hbm %s511_s0, 512 }
   0x3   :  { %s17_s16 = sshll.u32 %s425_s15, 4  ;;  %p354_p0 = scmp.ne.s32.totalorder %s511_s0, %s353_s19  ;;  %s18_s16 = int_to_ptr.vmem [resolvable:$true] %s17_s16 }
   0x4   :  { %p357_p1 = scmp.lt.u32.totalorder %s353_s19, %s511_s0 }
   0x6   :  { %p359_p2 = pnand %p357_p1, %p354_p0 }
   0x8   :  { %362 = shalt.err (!%p359_p2)
}
   0x9   :  { %s363_s24 = scalar_lea.vmem %s18_s16, 512  ;;  %p368_p4 = scmp.lt.s32.totalorder %s18_s16, %s18_s16 }
   0xa   :  { %p364_p3 = scmp.ne.s32.totalorder %s18_s16, %s363_s24  ;;  %p369_p5 = scmp.lt.s32.totalorder %s363_s24, %s363_s24 }
   0xc   :  { %p370_p6 = por %p369_p5, %p368_p4 }
   0xe   :  { %p371_p7 = pnand %p370_p6, %p364_p3 }
  0x10   :  { %374 = shalt.err (!%p371_p7)
}
  0x11   :  { %s426_s25 = smov 128   ;;  %s427_s26 = smov 8  }
  0x12   :  { %23 = dma.hbm_to_vmem [thread:$0]  %s511_s0, 512, %s18_s16, [#allocation3], %s426_s25, %s426_s25, %s427_s26  }
  0x13   :  { %s428_s29 = smov [#allocation5]   ;;  %s375_s7 = scalar_lea.hbm %s514_s3, 256 }
  0x14   :  { %s33_s30 = sshll.u32 %s428_s29, 4  ;;  %p376_p8 = scmp.ne.s32.totalorder %s514_s3, %s375_s7  ;;  %s34_s30 = int_to_ptr.vmem [resolvable:$true] %s33_s30 }
  0x15   :  { %p379_p9 = scmp.lt.u32.totalorder %s375_s7, %s514_s3 }
  0x17   :  { %p381_p10 = pnand %p379_p9, %p376_p8 }
  0x19   :  { %384 = shalt.err (!%p381_p10)
}
  0x1a   :  { %s385_s12 = scalar_lea.vmem %s34_s30, 256  ;;  %p390_p12 = scmp.lt.s32.totalorder %s34_s30, %s34_s30 }
  0x1b   :  { %p386_p11 = scmp.ne.s32.totalorder %s34_s30, %s385_s12  ;;  %p391_p13 = scmp.lt.s32.totalorder %s385_s12, %s385_s12 }
  0x1d   :  { %p392_p0 = por %p391_p13, %p390_p12 }
  0x1f   :  { %p393_p1 = pnand %p392_p0, %p386_p11 }
  0x21   :  { %396 = shalt.err (!%p393_p1)
}
  0x22   :  { %s429_s0 = smov 64   ;;  %s430_s13 = smov 4  }
  0x23   :  { %39 = dma.hbm_to_vmem [thread:$0]  %s514_s3, 256, %s34_s30, [#allocation6], %s429_s0, %s429_s0, %s430_s13  }
  0x24   :  { %419 = dma.done.wait [#allocation3], 512  }
  0x25   :  { %420 = vsyncadd [#allocation3], 4294966784 }
  0x26   :  { %421 = dma.done.wait [#allocation6], 256  }
  0x27   :  { %422 = vsyncadd [#allocation6], 4294967040  ;;  %vm51_vm0 = vcmask 261120   ;;  %v48_v0 = vld [vmem:[#allocation2 + $0x8] sm:$0xff]  ;;  %v50_v1 = vld [vmem:[#allocation2 + $0x18] sm:$0xff]  ;;  %vm291_vm1 = vcmask 781312  }
  0x28   :  { %v55_v2 = vsel %vm51_vm0, %v48_v0, 0.0  ;;  %v61_v3 = vsel %vm51_vm0, %v50_v1, 0.0  ;;  %v347_v14 = vld [vmem:[#allocation5] sm:$0xff]   ;;  %v348_v15 = vld [vmem:[#allocation5 + $0x8] sm:$0xff]   ;;  %v49_v33 = vld [vmem:[#allocation2 + $0x10] sm:$0xff] }
  0x29   :  { %56 = vadd.xlane.f32.xlu0 %v55_v2  ;;  %332 = vmatprep.subr.bf16.mxu0 %v347_v14  ;;  %v314_v23 = vld [vmem:[%s512_s1] ss:$0 sm:$0xff]  ;;  %s431_s1 = smov [#allocation7]  }
  0x2a   :  { %333 = vmatpush3.bf16.msra.mxu0 %v347_v14  ;;  %v315_v25 = vld [vmem:[%s513_s2] ss:$0 sm:$0xff]  ;;  %s301_s2 = sshll.u32 %s431_s1, 4  ;;  %s302_s2 = int_to_ptr.vmem [resolvable:$true] %s301_s2 }
  0x2b   :  { %334 = vmatprep.subr.bf16.mxu0 %v348_v15  ;;  %v47_v28 = vld [vmem:[#allocation2] sm:$0xff]  ;;  %s397_s19 = scalar_lea.vmem %s302_s2, 256  ;;  %p402_p3 = scmp.lt.s32.totalorder %s302_s2, %s302_s2 }
  0x2c   :  { %p398_p2 = scmp.ne.s32.totalorder %s302_s2, %s397_s19  ;;  %p403_p4 = scmp.lt.s32.totalorder %s397_s19, %s397_s19 }
  0x2d   :  { %62 = vadd.xlane.f32.xlu0 %v61_v3 }
  0x2e   :  { %335 = vmatpush3.bf16.msra.mxu0 %v348_v15  ;;  %p404_p5 = por %p403_p4, %p402_p3 }
  0x30   :  { %p405_p6 = pnand %p404_p5, %p398_p2 }
  0xb6   :  { %v57_v4 = vpop.xlane.xlu0 %56 }
  0xb7   :  { %v66_v5 = vmul.f32 0.03125, %v57_v4 }
  0xb9   :  { %v70_v6 = vsub.f32 %v48_v0, %v66_v5 }
  0xba   :  { %v63_v7 = vpop.xlane.xlu0 %62 }
  0xbb   :  { %v68_v8 = vmul.f32 0.03125, %v63_v7  ;;  %v74_v9 = vmul.f32 %v70_v6, %v70_v6 }
  0xbd   :  { %v72_v10 = vsub.f32 %v50_v1, %v68_v8  ;;  %v80_v11 = vsel %vm51_vm0, %v74_v9, 0.0 }
  0xbe   :  { %81 = vadd.xlane.f32.xlu1 %v80_v11 }
  0xbf   :  { %v76_v12 = vmul.f32 %v72_v10, %v72_v10 }
  0xc1   :  { %v86_v13 = vsel %vm51_vm0, %v76_v12, 0.0 }
  0xc2   :  { %87 = vadd.xlane.f32.xlu1 %v86_v13 }
 0x14b   :  { %v82_v16 = vpop.xlane.xlu1 %81 }
 0x14c   :  { %v90_v17 = vmul.f32 0.03125, %v82_v16 }
 0x14e   :  { %v94_v18 = vadd.f32 1e-05, %v90_v17 }
 0x14f   :  { %v88_v19 = vpop.xlane.xlu1 %87 }
 0x150   :  { %349 = vrsqrt.f32 %v94_v18  ;;  %v92_v20 = vmul.f32 0.03125, %v88_v19 }
 0x152   :  { %v96_v21 = vadd.f32 1e-05, %v92_v20 }
 0x154   :  { %351 = vrsqrt.f32 %v96_v21 }
 0x15a   :  { %v350_v22 = vpop.eup %349 }
 0x15b   :  { %v102_v24 = vmul.f32 %v350_v22, %v70_v6 }
 0x15d   :  { %v113_v26 = vmul.f32 %v314_v23, %v102_v24 }
 0x15e   :  { %v352_v27 = vpop.eup %351 }
 0x15f   :  { %v104_v29 = vmul.f32 %v352_v27, %v72_v10  ;;  %v124_v30 = vadd.f32 %v315_v25, %v113_v26 }
 0x161   :  { %v115_v31 = vmul.f32 %v314_v23, %v104_v29  ;;  %v202_v32 = vpack.c.bf16 %v124_v30, %v47_v28 }
 0x163   :  { %v126_v34 = vadd.f32 %v315_v25, %v115_v31  ;;  %336 = vmatprep.mubr.msk.bf16.mxu0 %vm51_vm0, %v202_v32 }
 0x165   :  { %v203_v35 = vpack.c.bf16 %v126_v34, %v49_v33 }
 0x167   :  { %337 = vmatmul.mubr.msk.bf16.vlgmr.msra.gmra.mrb[0].mxu0 %vm51_vm0, %v203_v35 }
 0x23a   :  { %v338_v36 = vpop.f32.mrb[0].mxu0 }
 0x23b   :  { %v326_v37 = vpack.c.bf16 %v338_v36, %v338_v36  ;;  %v260_v38 = vpop.f32.mrb[1].mxu0 }
 0x23c   :  { %v324_v39 = vpack.c.bf16 %v260_v38, %v260_v38  ;;  %v339_v40 = vpop.f32.mrb[2].mxu0 }
 0x23d   :  { %294 = vst.msk [vmem:[#allocation7 + $0x8] sm:$0xf] %vm291_vm1, %v326_v37  ;;  %v327_v41 = vpack.c.bf16 %v339_v40, %v339_v40  ;;  %v263_v42 = vpop.f32.mrb[3].mxu0 }
 0x23e   :  { %292 = vst.msk [vmem:[#allocation7] sm:$0xf] %vm291_vm1, %v324_v39  ;;  %v325_v43 = vpack.c.bf16 %v263_v42, %v263_v42 }
 0x23f   :  { %295 = vst.msk [vmem:[#allocation7 + $0xc] sm:$0xf] %vm291_vm1, %v327_v41 }
 0x240   :  { %293 = vst.msk [vmem:[#allocation7 + $0x4] sm:$0xf] %vm291_vm1, %v325_v43 }
 0x241   :  { %408 = shalt.err (!%p405_p6)
}
 0x242   :  { %s409_s22 = scalar_lea.hbm %s515_s4, 256 }
 0x243   :  { %p410_p7 = scmp.ne.s32.totalorder %s515_s4, %s409_s22  ;;  %p413_p8 = scmp.lt.u32.totalorder %s409_s22, %s515_s4 }
 0x245   :  { %p415_p9 = pnand %p413_p8, %p410_p7 }
 0x247   :  { %418 = shalt.err (!%p415_p9)
}
 0x248   :  { %307 = dma.vmem_to_hbm [thread:$0]  %s302_s2, 256, %s515_s4, [#allocation4], %s429_s0, %s429_s0, %s430_s13  }
 0x249   :  { %423 = dma.done.wait [#allocation4], 256  }
 0x24a   :  { %424 = vsyncadd [#allocation4], 4294967040 }
 0x24b   :  { %311 = vsyncpa [#allocation3], 1 }
 0x24c   :  { %312 = vsyncpa [#allocation6], 1 }
 0x24d   :  { %313 = vsyncpa [#allocation4], 1 }

</bundles_post_ra>
